<compile_context>
chip_gen: v6e
topology: v6e:2x2x1
jax: 0.10.0
libtpu: 0.0.40
codegen_flags: <defaults>
</compile_context>

<pallas_src>
import jax
import jax.numpy as jnp
import numpy as np
from jax.experimental import pallas as pl
from jax.experimental.pallas import tpu as pltpu


def outconv_kernel(x_ref, w_ref, b_ref, o_ref):
    # x_ref: (1, Cin, T)   w_ref: (Cout, Cin)   b_ref: (Cout, 1)   o_ref: (1, Cout, T)
    acc = jnp.dot(w_ref[...], x_ref[0], preferred_element_type=jnp.float32)   # MXU, f32 accumulation
    o_ref[0] = (acc + b_ref[...].astype(jnp.float32)).astype(o_ref.dtype)     # bias add + downcast, lane-dense store


def _vmem_capacity_bytes() -> int:
    """Physical VMEM per TensorCore (v5e/v6e: 128 MiB, v7x: 64 MiB)."""
    try:
        return int(pltpu.get_tpu_info().vmem_capacity_bytes)
    except Exception:
        return 64 * 1024 * 1024  # conservative default (v7x-sized)


def _const_spec(shape, index_map):
    """BlockSpec whose block index never changes: single-buffer it when supported."""
    try:
        return pl.BlockSpec(shape, index_map, pipeline_mode=pl.Buffered(1))
    except Exception:  # older jax without BlockSpec(pipeline_mode=...)
        return pl.BlockSpec(shape, index_map)


def _plan(n, cin, cout, hw, itemsize):
    """Pick (hw_padded, spatial_tile, vmem_limit_bytes) from a per-generation VMEM budget."""
    hw_pad = ((hw + 127) // 128) * 128
    cap = _vmem_capacity_bytes()
    limit = min(cap - (8 << 20), int(cap * 0.85))          # leave headroom for compiler scratch
    w_bytes = 2 * (cout * cin + cout) * itemsize           # weights + bias (assume 2 bufs: safe upper bound)
    budget = max(limit - w_bytes - (2 << 20), 0)
    per_col = 2 * (cin + cout) * itemsize                  # double-buffered x tile + out tile, per lane column
    t = max(min(budget // per_col, hw_pad), 128)
    t = (t // 128) * 128
    while hw_pad % t:                                      # tile must evenly divide padded extent
        t -= 128
    # Guarantee >= 2 grid steps so both v7x TensorCores get work under "parallel" semantics.
    if n * (hw_pad // t) < 2 and hw_pad // 128 >= 2:
        k = hw_pad // 128
        t = 128 * max(d for d in range(1, k) if k % d == 0)
    need = 2 * (cin + cout) * t * itemsize + w_bytes + (2 << 20)
    vmem_limit = int(min(cap, max(limit, need)))
    return hw_pad, t, vmem_limit


@jax.jit
def outconv(x_nchw, w, b):
    """1x1 Conv2d + bias. x_nchw: (N, Cin, H, W); w: (Cout, Cin, 1, 1) [PyTorch layout]; b: (Cout,)."""
    N, Cin, H, W = x_nchw.shape
    Cout = w.shape[0]
    HW = H * W
    dtype = x_nchw.dtype
    itemsize = jnp.dtype(dtype).itemsize
    hw_pad, T, vmem_limit = _plan(N, Cin, Cout, HW, itemsize)

    x = x_nchw.reshape(N, Cin, HW)                     # contiguous reshape: no copy, no upcast
    if hw_pad != HW:                                   # pad spatial to a multiple of 128 (lane-dense stores)
        x = jnp.pad(x, ((0, 0), (0, 0), (0, hw_pad - HW)))
    w2d = w.reshape(Cout, Cin).astype(dtype)           # hoisted, tiny
    bcol = b.reshape(Cout, 1).astype(dtype)

    out = pl.pallas_call(
        outconv_kernel,
        out_shape=jax.ShapeDtypeStruct((N, Cout, hw_pad), dtype),
        grid_spec=pltpu.PrefetchScalarGridSpec(
            num_scalar_prefetch=0,
            grid=(N, hw_pad // T),
            in_specs=[
                pl.BlockSpec((1, Cin, T), lambda n, j: (n, 0, j)),   # activation tile (auto-pipelined)
                _const_spec((Cout, Cin), lambda n, j: (0, 0)),       # resident weights (single-buffered)
                _const_spec((Cout, 1), lambda n, j: (0, 0)),         # resident bias
            ],
            out_specs=pl.BlockSpec((1, Cout, T), lambda n, j: (n, 0, j)),
        ),
        compiler_params=pltpu.CompilerParams(
            dimension_semantics=("parallel", "parallel"),            # independent steps -> megacore sharding
            vmem_limit_bytes=vmem_limit,
        ),
        cost_estimate=pl.CostEstimate(
            flops=2 * N * hw_pad * Cin * Cout,
            transcendentals=0,
            bytes_accessed=(N * hw_pad * (Cin + Cout) + Cout * Cin + Cout) * itemsize,
        ),
    )(x, w2d, bcol)

    if hw_pad != HW:
        out = out[:, :, :HW]
    return out.reshape(N, Cout, H, W)


def ref_outconv(x_nchw, w, b):
    """Pure-JAX reference matching the PyTorch forward (Conv2d 1x1 with bias)."""
    y = jax.lax.conv_general_dilated(
        x_nchw.astype(jnp.float32), w.astype(jnp.float32),
        window_strides=(1, 1), padding="VALID",
        dimension_numbers=("NCHW", "OIHW", "NCHW"))
    return y + b.reshape(1, -1, 1, 1).astype(jnp.float32)


if __name__ == "__main__":
    key = jax.random.PRNGKey(0)
    k_x, k_w, k_b = jax.random.split(key, 3)

    def check(x, w, b, rtol, atol):
        out = jax.block_until_ready(outconv(x, w, b))
        ref = jax.block_until_ready(ref_outconv(x, w, b))
        assert out.shape == ref.shape, (out.shape, ref.shape)
        np.testing.assert_allclose(np.asarray(out, dtype=np.float32),
                                   np.asarray(ref, dtype=np.float32), rtol=rtol, atol=atol)

    # Case 1: f32, HW multiple of 128, N=2 -> grid (2, 1).
    N, Cin, Cout, H, W = 2, 4, 8, 16, 16
    x = jax.random.normal(k_x, (N, Cin, H, W), jnp.float32)
    w = 0.2 * jax.random.normal(k_w, (Cout, Cin, 1, 1), jnp.float32)
    b = 0.1 * jax.random.normal(k_b, (Cout,), jnp.float32)
    check(x, w, b, 1e-5, 1e-5)

    # Case 2: bf16 end-to-end (no wrapper upcast; f32 MXU accumulation inside the kernel).
    check(x.astype(jnp.bfloat16), w.astype(jnp.bfloat16), b.astype(jnp.bfloat16), 2e-2, 2e-2)

    # Case 3: non-128-divisible spatial extent (10x10) -> wrapper pads to 128, slices back.
    x3 = jax.random.normal(k_x, (2, 4, 10, 10), jnp.float32)
    check(x3, w, b, 1e-5, 1e-5)

    # Case 4: N == 1 with a single natural tile -> tile split so v7x's 2nd TensorCore has work.
    x4 = jax.random.normal(k_x, (1, 4, 16, 16), jnp.float32)
    check(x4, w, b, 1e-5, 1e-5)

    print("KERNEL_OK")
</pallas_src>

<mosaic_0001>
module attributes {stable_mosaic.version = 11 : i64} {
  func.func @outconv_kernel(%arg0: i32, %arg1: i32, %arg2: memref<1x4x256xf32, #tpu.memory_space<vmem>>, %arg3: memref<8x4xf32, #tpu.memory_space<vmem>>, %arg4: memref<8x1xf32, #tpu.memory_space<vmem>>, %arg5: memref<1x8x256xf32, #tpu.memory_space<vmem>>) attributes {dimension_semantics = [#tpu.dimension_semantics<parallel>, #tpu.dimension_semantics<parallel>], iteration_bounds = array<i64: 2, 1>, scalar_prefetch = 0 : i64, scratch_operands = 0 : i64, tpu.core_type = #tpu.core_type<tc>, window_params = [{transform_indices = @transform_0, window_bounds = array<i64: 1, 4, 256>}, {pipeline_mode = #tpu.pipeline_mode<synchronous>, transform_indices = @transform_1, window_bounds = array<i64: 8, 4>}, {pipeline_mode = #tpu.pipeline_mode<synchronous>, transform_indices = @transform_2, window_bounds = array<i64: 8, 1>}, {transform_indices = @transform_3, window_bounds = array<i64: 1, 8, 256>}]} {
    %c0 = arith.constant 0 : index
    %c0_0 = arith.constant 0 : index
    %0 = vector.load %arg3[%c0, %c0_0] : memref<8x4xf32, #tpu.memory_space<vmem>>, vector<8x4xf32>
    %c0_1 = arith.constant 0 : index
    %c0_2 = arith.constant 0 : index
    %c0_3 = arith.constant 0 : index
    %1 = vector.load %arg2[%c0_1, %c0_2, %c0_3] : memref<1x4x256xf32, #tpu.memory_space<vmem>>, vector<1x4x256xf32>
    %2 = vector.shape_cast %1 : vector<1x4x256xf32> to vector<4x256xf32>
    %cst = arith.constant dense<0.000000e+00> : vector<8x256xf32>
    %3 = tpu.matmul %0, %2, %cst {dimension_numbers = #tpu.dot_dimension_numbers<[1], [0], [0], [1], [0, 0, 1, 1], [], []>} : vector<8x4xf32>, vector<4x256xf32>, vector<8x256xf32> -> vector<8x256xf32>
    %c0_4 = arith.constant 0 : index
    %c0_5 = arith.constant 0 : index
    %4 = vector.load %arg4[%c0_4, %c0_5] : memref<8x1xf32, #tpu.memory_space<vmem>>, vector<8x1xf32>
    %5 = vector.broadcast %4 : vector<8x1xf32> to vector<8x256xf32>
    %6 = arith.addf %3, %5 : vector<8x256xf32>
    %c0_6 = arith.constant 0 : index
    %c0_7 = arith.constant 0 : index
    %c0_8 = arith.constant 0 : index
    %7 = vector.load %arg5[%c0_6, %c0_7, %c0_8] : memref<1x8x256xf32, #tpu.memory_space<vmem>>, vector<1x8x256xf32>
    %8 = vector.shape_cast %7 : vector<1x8x256xf32> to vector<8x256xf32>
    %9 = vector.shape_cast %6 : vector<8x256xf32> to vector<1x8x256xf32>
    tpu.vector_store %arg5[%c0_6, %c0_7, %c0_8], %9 {strides = array<i32>} : memref<1x8x256xf32, #tpu.memory_space<vmem>>, vector<1x8x256xf32>,
    return
  }
  func.func @transform_0(%arg0: i32, %arg1: i32) -> (i32, i32, i32) {
    %c0_i32 = arith.constant 0 : i32
    %c0_i32_0 = arith.constant 0 : i32
    return %arg0, %c0_i32, %arg1 : i32, i32, i32
  }
  func.func @transform_1(%arg0: i32, %arg1: i32) -> (i32, i32) {
    %c0_i32 = arith.constant 0 : i32
    %c0_i32_0 = arith.constant 0 : i32
    %c0_i32_1 = arith.constant 0 : i32
    return %c0_i32, %c0_i32_0 : i32, i32
  }
  func.func @transform_2(%arg0: i32, %arg1: i32) -> (i32, i32) {
    %c0_i32 = arith.constant 0 : i32
    %c0_i32_0 = arith.constant 0 : i32
    %c0_i32_1 = arith.constant 0 : i32
    return %c0_i32, %c0_i32_0 : i32, i32
  }
  func.func @transform_3(%arg0: i32, %arg1: i32) -> (i32, i32, i32) {
    %c0_i32 = arith.constant 0 : i32
    %c0_i32_0 = arith.constant 0 : i32
    return %arg0, %c0_i32, %arg1 : i32, i32, i32
  }
}

</mosaic_0001>

<bundles_post_ra>
// kernel: outconv.1
= control target key start
LH: loop header
LB: loop body
LE: loop exit
PB: predicated region body
PF: predicated region fallthrough
CT: control target
= control target key end

     0   :  { %s479_s12 = smov 0   ;;  %s481_s13 = smov 0   ;;  %s518_s0 = inlined_call_operand.vmem [shape: f32[2,4,256], index: 0, kind: input, shape index: {}]   ;;  %s519_s1 = inlined_call_operand.vmem [shape: f32[8,4], index: 1, kind: input, shape index: {}]   ;;  %s520_s2 = inlined_call_operand.vmem [shape: f32[8,1], index: 2, kind: input, shape index: {}]   ;;  %s521_s3 = inlined_call_operand.vmem [shape: f32[2,8,256], index: 3, kind: output, shape index: {}]  }
   0x1   :  { %s483_s14 = smov 0  }
   0x2 LB: > { %s25_s15 = sadd.s32 1, %s451_s13  ;;  %p393_p0 = scmp.ge.s32.totalorder %s455_s14, 1  ;;  %s455_s14 = sphi %s483_s14, %s13_s14   ;;  %s451_s13 = sphi %s481_s13, %s523_s13   ;;  %s447_s12 = sphi %s479_s12, %s522_s12  }
   0x3   : > { %p27_p1 = scmp.ge.s32.totalorder %s25_s15, 2  ;;  %p158_p2 = scmp.lt.s32.totalorder %s455_s14, 3 }
   0x5   : > { %s525_s15 = smov (%p27_p1, %s25_s15), 0  ;;  %p159_p3 = pnand %p393_p0, %p158_p2 }
   0x6   : > { %p191_p4 = scmp.lt.s32.totalorder (!%p159_p3), %s447_s12, 1 }
   0x7   : > { %162 = sbr.rel (%p159_p3) target bundleno = 218 (0xda), region = 32 }
   0xc   : > { %v457_v0 = vmov 0.0   ;;  %v458_v1 = vmov 0   ;;  %v212_v2 = vld [vmem:[%s520_s2] sm:$0xff]  ;;  %s527_s12 = smov (!%p191_p4, %s447_s12), 1  ;;  %vm224_vm0 = vcmask 1043456   ;;  %vm220_vm1 = vcmask 31744  }
   0xd   : > { %293 = vmatprep.mubr.f32.mxu0 %v457_v0  ;;  %431 = vset.pattern.permute.xlu0 %v458_v1  ;;  %s403_s18 = sshll.u32 %s527_s12, 3  ;;  %v210_v5 = vld [vmem:[%s519_s1] sm:$0xff]  ;;  %s404_s24 = sshll.u32 %s527_s12, 4 }
   0xe   : > { %215 = vperm.xlu0 %431, %v212_v2   ;;  %s198_s21 = scalar_lea.vmem %s518_s0, %s403_s18  ;;  %s208_s27 = scalar_lea.vmem %s521_s3, %s404_s24 }
   0xf   : > { %v211_v3 = vld [vmem:[%s198_s21] sm:$0xff] }
  0x10   : > { %v219_v4 = vcombine.high %v211_v3, %v211_v3 }
  0x12   : > { %398 = vmatprep.subr.msk.mxu0 %vm224_vm0, %v219_v4 }
  0x13   : > { %399 = vmatpush1.msk.msra.mxu0 %vm224_vm0, %v211_v3 }
  0x14   : > { %400 = vmatmul.mubr.msk.f32.vlgmr.msra.gmra.mxu0 %vm220_vm1, %v210_v5 }
  0x89   : > { %v216_v6 = vpop.permute.xlu0 %215 }
  0xd4   : > { %v295_v7 = vpop.f32.mrf.mxu0 }
  0xd5   : > { %v296_v8 = vadd.f32 %v295_v7, %v216_v6 }
  0xd6   : > { %v297_v9 = vpop.f32.mrf.mxu0 }
  0xd7   : > { %300 = vst [vmem:[%s208_s27] sm:$0xff] %v296_v8  ;;  %v298_v10 = vadd.f32 %v297_v9, %v216_v6 }
  0xd9   : > { %301 = vst [vmem:[%s208_s27 + $0x8] sm:$0xff] %v298_v10 }
  0xda PF: > { %s13_s14 = sadd.s32 1, %s455_s14   ;;  %s522_s12 = smov %s451_s13 }
  0xdb   : > { %p10_p5 = scmp.ge.s32.totalorder %s13_s14, 4   ;;  %s523_s13 = smov %s525_s15 }
  0xdd   :  { %12 = sbr.rel (!%p10_p5) target bundleno = 2 (0x2), region = 62 }

</bundles_post_ra>
